<compile_context>
chip_gen: v6e
topology: v6e:2x2x1
jax: 0.10.0
libtpu: 0.0.40
codegen_flags: <defaults>
</compile_context>

<pallas_src>
import math
from functools import partial

import jax
import jax.numpy as jnp
from jax.experimental import pallas as pl
from jax.experimental.pallas import tpu as pltpu

_LANE = 128     # bias-pack width (all layer widths <= 128)
_SUBLANE = 8


def _round_up(n, m):
    return -(-n // m) * m


def _default_relu_bf16():
    """bf16 ReLU on chips with a bf16 VALU (v6e/v7x); f32 on older chips."""
    try:
        kind = jax.devices()[0].device_kind.lower()
    except Exception:
        return True
    return not any(v in kind for v in ("v2", "v3", "v4", "v5"))


def _ik_mlp_kernel(x_ref, w1_ref, w2_ref, w3_ref, w4_ref, bias_ref, o_ref,
                   *, relu_bf16):
    """Fused 4-layer MLP: (Linear -> ReLU) x3 -> Linear.

    bf16 operands on the MXU with f32 accumulation.  The bias add stays in
    f32; the ReLU runs in bf16 or f32 depending on `relu_bf16`.
    """
    b = bias_ref[...]                         # (4, 128) f32, row i = bias of layer i
    h = x_ref[...].astype(jnp.bfloat16)       # in-kernel cast of the f32 input tile

    def linear_relu(h, w_ref, bias_row):
        n = w_ref.shape[1]
        a = jnp.dot(h, w_ref[...], preferred_element_type=jnp.float32)
        a = a + bias_row[:, :n]
        if relu_bf16:
            return jnp.maximum(a.astype(jnp.bfloat16), 0.0)        # bf16 VALU
        return jnp.maximum(a, 0.0).astype(jnp.bfloat16)            # f32 VALU (v5e)

    h = linear_relu(h, w1_ref, b[0:1])
    h = linear_relu(h, w2_ref, b[1:2])
    h = linear_relu(h, w3_ref, b[2:3])

    o = jnp.dot(h, w4_ref[...], preferred_element_type=jnp.float32)
    o_ref[...] = o + b[3:4, : w4_ref.shape[1]]      # narrow (tb, out_pad) f32 store


def prepare_params(params, out_pad=None):
    """One-time, per-model operand preparation (hoisted out of the call path).

    Returns bf16 weights (final layer zero-padded to `out_pad` lanes) and the
    four biases packed into a single (4, 128) f32 operand.
    """
    (w1, b1), (w2, b2), (w3, b3), (w4, b4) = params
    in_dim, out_dim = w1.shape[0], w4.shape[1]
    assert out_dim <= _LANE and w2.shape[1] <= _LANE and w3.shape[1] <= _LANE, (
        "bias pack assumes all layer widths <= 128")
    if out_pad is None:
        out_pad = max(_SUBLANE, _round_up(out_dim, _SUBLANE))

    w1b = w1.astype(jnp.bfloat16)
    w2b = w2.astype(jnp.bfloat16)
    w3b = w3.astype(jnp.bfloat16)
    w4b = jnp.pad(w4, ((0, 0), (0, out_pad - out_dim))).astype(jnp.bfloat16)

    def _pad_row(b):
        return jnp.pad(b.reshape(1, -1), ((0, 0), (0, _LANE - b.size)))

    bias_pack = jnp.concatenate(
        [_pad_row(b1), _pad_row(b2), _pad_row(b3), _pad_row(b4)], axis=0
    ).astype(jnp.float32)

    return {
        "weights": (w1b, w2b, w3b, w4b),
        "bias_pack": bias_pack,
        "in_dim": in_dim,
        "out_dim": out_dim,
        "out_pad": out_pad,
    }


def ik_mlp_forward(x, prepared, *, batch_tile=512, relu_bf16=None):
    """Fused MLP forward. x: (B, input_dim) f32 -> (B, output_dim) f32."""
    w1b, w2b, w3b, w4b = prepared["weights"]
    bias_pack = prepared["bias_pack"]
    out_dim, out_pad = prepared["out_dim"], prepared["out_pad"]
    B, in_dim = x.shape
    assert in_dim == prepared["in_dim"]

    if relu_bf16 is None:
        relu_bf16 = _default_relu_bf16()

    # ---- tile / grid selection --------------------------------------------
    # Large batches: >= 2 grid steps so both v7x TensorCores get work; tiles
    # are multiples of 256 rows (MXU-friendly) capped at batch_tile.
    # Small batches: one exact-size block (equals the array dim, so no
    # divisibility constraint, no wrapper padding, no OOB block).
    if B > 256:
        half = -(-B // 2)
        tb = min(batch_tile, _round_up(half, 256))
    else:
        tb = B
    grid_b = pl.cdiv(B, tb)

    kernel = partial(_ik_mlp_kernel, relu_bf16=relu_bf16)

    out = pl.pallas_call(
        kernel,
        out_shape=jax.ShapeDtypeStruct((B, out_pad), jnp.float32),
        grid_spec=pltpu.PrefetchScalarGridSpec(
            num_scalar_prefetch=0,
            grid=(grid_b,),
            in_specs=[
                pl.BlockSpec((tb, in_dim), lambda i: (i, 0)),
                pl.BlockSpec(w1b.shape, lambda i: (0, 0)),
                pl.BlockSpec(w2b.shape, lambda i: (0, 0)),
                pl.BlockSpec(w3b.shape, lambda i: (0, 0)),
                pl.BlockSpec(w4b.shape, lambda i: (0, 0)),
                pl.BlockSpec(bias_pack.shape, lambda i: (0, 0)),
            ],
            out_specs=pl.BlockSpec((tb, out_pad), lambda i: (i, 0)),
        ),
        compiler_params=pltpu.CompilerParams(
            dimension_semantics=("parallel",),
            vmem_limit_bytes=32 * 1024 * 1024,
        ),
    )(x, w1b, w2b, w3b, w4b, bias_pack)

    return out[:, :out_dim]


def init_params(key, input_dim, output_dim):
    """Deterministic init mimicking nn.Linear's U(-1/sqrt(fan_in), 1/sqrt(fan_in)).
    Weights stored as (in, out) so y = x @ W + b matches PyTorch's x @ W.T + b."""
    dims = [input_dim, 64, 128, 64, output_dim]
    params = []
    for i in range(4):
        fan_in, fan_out = dims[i], dims[i + 1]
        key, kw, kb = jax.random.split(key, 3)
        bound = 1.0 / math.sqrt(fan_in)
        w = jax.random.uniform(kw, (fan_in, fan_out), jnp.float32, -bound, bound)
        b = jax.random.uniform(kb, (fan_out,), jnp.float32, -bound, bound)
        params.append((w, b))
    return params


def reference_forward(x, params):
    """Pure-JAX reference mirroring the kernel's bf16-operand / f32-accumulate recipe."""
    h = x.astype(jnp.bfloat16).astype(jnp.float32)
    for i, (w, b) in enumerate(params):
        w32 = w.astype(jnp.bfloat16).astype(jnp.float32)
        h = h @ w32 + b
        if i < 3:
            h = jnp.maximum(h, 0.0).astype(jnp.bfloat16).astype(jnp.float32)
    return h


if __name__ == "__main__":
    # IK-style shapes: 7-D end-effector pose in, 6 joint angles out.
    input_dim, output_dim = 7, 6
    params = init_params(jax.random.PRNGKey(0), input_dim, output_dim)
    prepared = prepare_params(params)   # one-time operand prep (opt 3)

    key = jax.random.PRNGKey(0)
    # batch=8: tiny exact-block path; batch=37: non-multiple-of-8 exact block;
    # batch=600: 2-step grid with a ragged last block (v7x 2-TC path).
    for batch in (8, 37, 600):
        kx = jax.random.fold_in(key, batch)
        x = jax.random.normal(kx, (batch, input_dim), jnp.float32)

        out = jax.block_until_ready(ik_mlp_forward(x, prepared))
        ref = reference_forward(x, params)

        assert out.shape == (batch, output_dim)
        assert jnp.allclose(out, ref, atol=1e-2, rtol=1e-2), "mismatch vs reference"

    print("KERNEL_OK")
</pallas_src>

<mosaic_0001>
module attributes {stable_mosaic.version = 11 : i64} {
  func.func @_ik_mlp_kernel(%arg0: i32, %arg1: memref<8x7xf32, #tpu.memory_space<vmem>>, %arg2: memref<7x64xbf16, #tpu.memory_space<vmem>>, %arg3: memref<64x128xbf16, #tpu.memory_space<vmem>>, %arg4: memref<128x64xbf16, #tpu.memory_space<vmem>>, %arg5: memref<64x8xbf16, #tpu.memory_space<vmem>>, %arg6: memref<4x128xf32, #tpu.memory_space<vmem>>, %arg7: memref<8x8xf32, #tpu.memory_space<vmem>>) attributes {dimension_semantics = [#tpu.dimension_semantics<parallel>], iteration_bounds = array<i64: 1>, scalar_prefetch = 0 : i64, scratch_operands = 0 : i64, tpu.core_type = #tpu.core_type<tc>, window_params = [{transform_indices = @transform_0, window_bounds = array<i64: 8, 7>}, {pipeline_mode = #tpu.pipeline_mode<synchronous>, transform_indices = @transform_1, window_bounds = array<i64: 7, 64>}, {pipeline_mode = #tpu.pipeline_mode<synchronous>, transform_indices = @transform_2, window_bounds = array<i64: 64, 128>}, {pipeline_mode = #tpu.pipeline_mode<synchronous>, transform_indices = @transform_3, window_bounds = array<i64: 128, 64>}, {pipeline_mode = #tpu.pipeline_mode<synchronous>, transform_indices = @transform_4, window_bounds = array<i64: 64, 8>}, {pipeline_mode = #tpu.pipeline_mode<synchronous>, transform_indices = @transform_5, window_bounds = array<i64: 4, 128>}, {transform_indices = @transform_6, window_bounds = array<i64: 8, 8>}]} {
    %c0 = arith.constant 0 : index
    %c0_0 = arith.constant 0 : index
    %0 = vector.load %arg6[%c0, %c0_0] : memref<4x128xf32, #tpu.memory_space<vmem>>, vector<4x128xf32>
    %c0_1 = arith.constant 0 : index
    %c0_2 = arith.constant 0 : index
    %1 = vector.load %arg1[%c0_1, %c0_2] : memref<8x7xf32, #tpu.memory_space<vmem>>, vector<8x7xf32>
    %2 = arith.truncf %1 : vector<8x7xf32> to vector<8x7xbf16>
    %3 = vector.extract_strided_slice %0 {offsets = [0, 0], sizes = [1, 128], strides = [1, 1]} : vector<4x128xf32> to vector<1x128xf32>
    %c0_3 = arith.constant 0 : index
    %c0_4 = arith.constant 0 : index
    %4 = vector.load %arg2[%c0_3, %c0_4] : memref<7x64xbf16, #tpu.memory_space<vmem>>, vector<7x64xbf16>
    %cst = arith.constant dense<0.000000e+00> : vector<8x64xf32>
    %5 = tpu.matmul %2, %4, %cst {dimension_numbers = #tpu.dot_dimension_numbers<[1], [0], [0], [1], [0, 0, 1, 1], [], []>} : vector<8x7xbf16>, vector<7x64xbf16>, vector<8x64xf32> -> vector<8x64xf32>
    %6 = vector.extract_strided_slice %3 {offsets = [0, 0], sizes = [1, 64], strides = [1, 1]} : vector<1x128xf32> to vector<1x64xf32>
    %7 = vector.broadcast %6 : vector<1x64xf32> to vector<8x64xf32>
    %8 = arith.addf %5, %7 : vector<8x64xf32>
    %9 = arith.truncf %8 : vector<8x64xf32> to vector<8x64xbf16>
    %cst_5 = arith.constant 0.000000e+00 : bf16
    %10 = vector.broadcast %cst_5 : bf16 to vector<8x64xbf16>
    %11 = arith.maximumf %9, %10 : vector<8x64xbf16>
    %12 = vector.extract_strided_slice %0 {offsets = [1, 0], sizes = [1, 128], strides = [1, 1]} : vector<4x128xf32> to vector<1x128xf32>
    %c0_6 = arith.constant 0 : index
    %c0_7 = arith.constant 0 : index
    %13 = vector.load %arg3[%c0_6, %c0_7] : memref<64x128xbf16, #tpu.memory_space<vmem>>, vector<64x128xbf16>
    %cst_8 = arith.constant dense<0.000000e+00> : vector<8x128xf32>
    %14 = tpu.matmul %11, %13, %cst_8 {dimension_numbers = #tpu.dot_dimension_numbers<[1], [0], [0], [1], [0, 0, 1, 1], [], []>} : vector<8x64xbf16>, vector<64x128xbf16>, vector<8x128xf32> -> vector<8x128xf32>
    %15 = vector.broadcast %12 : vector<1x128xf32> to vector<8x128xf32>
    %16 = arith.addf %14, %15 : vector<8x128xf32>
    %17 = arith.truncf %16 : vector<8x128xf32> to vector<8x128xbf16>
    %cst_9 = arith.constant 0.000000e+00 : bf16
    %18 = vector.broadcast %cst_9 : bf16 to vector<8x128xbf16>
    %19 = arith.maximumf %17, %18 : vector<8x128xbf16>
    %20 = vector.extract_strided_slice %0 {offsets = [2, 0], sizes = [1, 128], strides = [1, 1]} : vector<4x128xf32> to vector<1x128xf32>
    %c0_10 = arith.constant 0 : index
    %c0_11 = arith.constant 0 : index
    %21 = vector.load %arg4[%c0_10, %c0_11] : memref<128x64xbf16, #tpu.memory_space<vmem>>, vector<128x64xbf16>
    %cst_12 = arith.constant dense<0.000000e+00> : vector<8x64xf32>
    %22 = tpu.matmul %19, %21, %cst_12 {dimension_numbers = #tpu.dot_dimension_numbers<[1], [0], [0], [1], [0, 0, 1, 1], [], []>} : vector<8x128xbf16>, vector<128x64xbf16>, vector<8x64xf32> -> vector<8x64xf32>
    %23 = vector.extract_strided_slice %20 {offsets = [0, 0], sizes = [1, 64], strides = [1, 1]} : vector<1x128xf32> to vector<1x64xf32>
    %24 = vector.broadcast %23 : vector<1x64xf32> to vector<8x64xf32>
    %25 = arith.addf %22, %24 : vector<8x64xf32>
    %26 = arith.truncf %25 : vector<8x64xf32> to vector<8x64xbf16>
    %cst_13 = arith.constant 0.000000e+00 : bf16
    %27 = vector.broadcast %cst_13 : bf16 to vector<8x64xbf16>
    %28 = arith.maximumf %26, %27 : vector<8x64xbf16>
    %c0_14 = arith.constant 0 : index
    %c0_15 = arith.constant 0 : index
    %29 = vector.load %arg5[%c0_14, %c0_15] : memref<64x8xbf16, #tpu.memory_space<vmem>>, vector<64x8xbf16>
    %cst_16 = arith.constant dense<0.000000e+00> : vector<8x8xf32>
    %30 = tpu.matmul %28, %29, %cst_16 {dimension_numbers = #tpu.dot_dimension_numbers<[1], [0], [0], [1], [0, 0, 1, 1], [], []>} : vector<8x64xbf16>, vector<64x8xbf16>, vector<8x8xf32> -> vector<8x8xf32>
    %31 = vector.extract_strided_slice %0 {offsets = [3, 0], sizes = [1, 8], strides = [1, 1]} : vector<4x128xf32> to vector<1x8xf32>
    %32 = vector.broadcast %31 : vector<1x8xf32> to vector<8x8xf32>
    %33 = arith.addf %30, %32 : vector<8x8xf32>
    %c0_17 = arith.constant 0 : index
    %c0_18 = arith.constant 0 : index
    %34 = vector.load %arg7[%c0_17, %c0_18] : memref<8x8xf32, #tpu.memory_space<vmem>>, vector<8x8xf32>
    tpu.vector_store %arg7[%c0_17, %c0_18], %33 {strides = array<i32>} : memref<8x8xf32, #tpu.memory_space<vmem>>, vector<8x8xf32>,
    return
  }
  func.func @transform_0(%arg0: i32) -> (i32, i32) {
    %c0_i32 = arith.constant 0 : i32
    %c0_i32_0 = arith.constant 0 : i32
    return %arg0, %c0_i32 : i32, i32
  }
  func.func @transform_1(%arg0: i32) -> (i32, i32) {
    %c0_i32 = arith.constant 0 : i32
    %c0_i32_0 = arith.constant 0 : i32
    %c0_i32_1 = arith.constant 0 : i32
    return %c0_i32, %c0_i32_0 : i32, i32
  }
  func.func @transform_2(%arg0: i32) -> (i32, i32) {
    %c0_i32 = arith.constant 0 : i32
    %c0_i32_0 = arith.constant 0 : i32
    %c0_i32_1 = arith.constant 0 : i32
    return %c0_i32, %c0_i32_0 : i32, i32
  }
  func.func @transform_3(%arg0: i32) -> (i32, i32) {
    %c0_i32 = arith.constant 0 : i32
    %c0_i32_0 = arith.constant 0 : i32
    %c0_i32_1 = arith.constant 0 : i32
    return %c0_i32, %c0_i32_0 : i32, i32
  }
  func.func @transform_4(%arg0: i32) -> (i32, i32) {
    %c0_i32 = arith.constant 0 : i32
    %c0_i32_0 = arith.constant 0 : i32
    %c0_i32_1 = arith.constant 0 : i32
    return %c0_i32, %c0_i32_0 : i32, i32
  }
  func.func @transform_5(%arg0: i32) -> (i32, i32) {
    %c0_i32 = arith.constant 0 : i32
    %c0_i32_0 = arith.constant 0 : i32
    %c0_i32_1 = arith.constant 0 : i32
    return %c0_i32, %c0_i32_0 : i32, i32
  }
  func.func @transform_6(%arg0: i32) -> (i32, i32) {
    %c0_i32 = arith.constant 0 : i32
    %c0_i32_0 = arith.constant 0 : i32
    return %arg0, %c0_i32 : i32, i32
  }
}

</mosaic_0001>

<bundles_post_ra>
// kernel: tpu_custom_call.1
= control target key start
LH: loop header
LB: loop body
LE: loop exit
PB: predicated region body
PF: predicated region fallthrough
CT: control target
= control target key end

     0   :  { %vm37_vm0 = vcmask 1042432   ;;  %vm38_vm1 = vcmask 1043456   ;;  %v506_v1 = vmov 0.0   ;;  %v507_v2 = vmov 65535   ;;  %s633_s0 = inlined_call_operand.vmem [shape: f32[8,7], index: 0, kind: input, shape index: {}]   ;;  %s634_s1 = inlined_call_operand.vmem [shape: bf16[7,64], index: 1, kind: input, shape index: {}]   ;;  %s635_s2 = inlined_call_operand.vmem [shape: bf16[64,128], index: 2, kind: input, shape index: {}]   ;;  %s636_s3 = inlined_call_operand.vmem [shape: bf16[128,64], index: 3, kind: input, shape index: {}]   ;;  %s637_s4 = inlined_call_operand.vmem [shape: bf16[64,8], index: 4, kind: input, shape index: {}]   ;;  %s638_s5 = inlined_call_operand.vmem [shape: f32[4,128], index: 5, kind: input, shape index: {}]   ;;  %s639_s6 = inlined_call_operand.hbm [shape: f32[8,8], index: 6, kind: output, shape index: {}]  }
   0x1   :  { %v28_v0 = vld [vmem:[%s634_s1] sm:$0xf]  ;;  %413 = vmatprep.subr.bf16.mxu0 %v506_v1  ;;  %v39_v3 = vsel %vm37_vm0, 4294967295, %v507_v2  ;;  %419 = vmatprep.subr.bf16.mxu1 %v506_v1  ;;  %vm508_vm2 = vmmov 0   ;;  %v468_v6 = vld [vmem:[%s635_s2 + $0x18] sm:$0xff]   ;;  %v469_v8 = vld [vmem:[%s635_s2 + $0x10] sm:$0xff]  }
   0x2   :  { %v26_v4 = vld [vmem:[%s633_s0] sm:$0xff]  ;;  %v40_v5 = vsel %vm38_vm1, %v39_v3, 0  ;;  %415 = vmatprep.mubr.msk.bf16.mxu0 %vm508_vm2, %v506_v1  ;;  %427 = vmatprep.mubr.msk.bf16.mxu1 %vm508_vm2, %v506_v1  ;;  %vm33_vm3 = vcmask 56320  }
   0x3   :  { %v42_v7 = vand.u32 %v40_v5, %v28_v0  ;;  %v27_v9 = vpack.c.bf16 %v26_v4, %v26_v4  ;;  %420 = vmatpush3.bf16.msra.mxu1 %v468_v6 }
   0x4   :  { %421 = vmatprep.subr.bf16.mxu1 %v506_v1 }
   0x5   :  { %414 = vmatpush3.bf16.msra.mxu0 %v42_v7 }
   0x6   :  { %431 = vmatprep.subr.bf16.mxu0 %v506_v1 }
   0x7   :  { %422 = vmatpush3.bf16.msra.mxu1 %v469_v8 }
   0x8   :  { %416 = vmatmul.mubr.msk.bf16.vlgmr.msra.gmra.mxu0 %vm33_vm3, %v27_v9  ;;  %423 = vmatprep.subr.bf16.mxu1 %v506_v1 }
   0x9   :  { %447 = vmatprep.mubr.msk.bf16.mxu0 %vm508_vm2, %v506_v1 }
   0xa   :  { %11 = vsyncpa [#allocation3], 0  ;;  %v470_v10 = vld [vmem:[%s635_s2 + $0x8] sm:$0xff]   ;;  %v471_v11 = vld [vmem:[%s635_s2] sm:$0xff]   ;;  %v29_v18 = vlaneseq  ;;  %vm122_vm4 = vcmask 523264   ;;  %v509_v28 = vmov 0  }
   0xb   :  { %424 = vmatpush3.bf16.msra.mxu1 %v470_v10  ;;  %v472_v12 = vld [vmem:[%s636_s3 + $0x38] sm:$0xff]   ;;  %v473_v13 = vld [vmem:[%s636_s3 + $0x30] sm:$0xff]   ;;  %v474_v14 = vld [vmem:[%s636_s3 + $0x28] sm:$0xff]   ;;  %s510_s28 = smov [#allocation2]   ;;  %vm357_vm5 = vcmask 64512  }
   0xc   :  { %425 = vmatprep.subr.bf16.mxu1 %v506_v1  ;;  %432 = vmatpush3.bf16.msra.mxu0 %v472_v12  ;;  %v475_v15 = vld [vmem:[%s636_s3 + $0x20] sm:$0xff]   ;;  %v476_v16 = vld [vmem:[%s636_s3 + $0x18] sm:$0xff]   ;;  %v477_v17 = vld [vmem:[%s636_s3 + $0x10] sm:$0xff]   ;;  %v30_v19 = vshrl.u32 %v29_v18, 7  ;;  %s365_s29 = sshll.u32 %s510_s28, 4  ;;  %s366_s29 = int_to_ptr.vmem [resolvable:$true] %s365_s29 }
   0xd   :  { %433 = vmatprep.subr.bf16.mxu0 %v506_v1  ;;  %v25_v21 = vld [vmem:[%s638_s5] sm:$0xf]  ;;  %v478_v31 = vld [vmem:[%s636_s3 + $0x8] sm:$0xff]   ;;  %v480_v33 = vld [vmem:[%s637_s4 + $0x18] sm:$0xff]   ;;  %p489_p1 = scmp.lt.s32.totalorder %s366_s29, %s366_s29 }
   0xe   :  { %v31_v20 = vsub.s32 0, %v30_v19  ;;  %v479_v32 = vld [vmem:[%s636_s3] sm:$0xff]   ;;  %v481_v34 = vld [vmem:[%s637_s4 + $0x10] sm:$0xff]   ;;  %v96_v35 = vsub.s32 1, %v30_v19  ;;  %v482_v44 = vld [vmem:[%s637_s4 + $0x8] sm:$0xff]   ;;  %v186_v46 = vsub.s32 2, %v30_v19 }
   0xf   :  { %426 = vmatpush3.bf16.msra.mxu1 %v471_v11  ;;  %v483_v45 = vld [vmem:[%s637_s4] sm:$0xff]   ;;  %v288_v55 = vsub.s32 3, %v30_v19  ;;  %s484_s4 = scalar_lea.vmem %s366_s29, 128 }
  0x10   :  { %451 = vmatprep.subr.bf16.mxu1 %v506_v1  ;;  %434 = vmatpush3.bf16.msra.mxu0 %v473_v13  ;;  %v32_v22 = vrot.slane %v25_v21, %v31_v20  ;;  %v97_v36 = vrot.slane %v25_v21, %v96_v35  ;;  %v187_v47 = vrot.slane %v25_v21, %v186_v46  ;;  %p485_p0 = scmp.ne.s32.totalorder %s366_s29, %s484_s4  ;;  %p490_p2 = scmp.lt.s32.totalorder %s484_s4, %s484_s4 }
  0x11   :  { %435 = vmatprep.subr.bf16.mxu0 %v506_v1  ;;  %v289_v56 = vrot.slane %v25_v21, %v288_v55 }
  0x12   :  { %p491_p3 = por %p490_p2, %p489_p1 }
  0x14   :  { %436 = vmatpush3.bf16.msra.mxu0 %v474_v14  ;;  %p492_p4 = pnand %p491_p3, %p485_p0 }
  0x15   :  { %437 = vmatprep.subr.bf16.mxu0 %v506_v1 }
  0x18   :  { %438 = vmatpush3.bf16.msra.mxu0 %v475_v15 }
  0x19   :  { %439 = vmatprep.subr.bf16.mxu0 %v506_v1 }
  0x1c   :  { %440 = vmatpush3.bf16.msra.mxu0 %v476_v16 }
  0x1d   :  { %441 = vmatprep.subr.bf16.mxu0 %v506_v1 }
  0x20   :  { %442 = vmatpush3.bf16.msra.mxu0 %v477_v17 }
  0x21   :  { %443 = vmatprep.subr.bf16.mxu0 %v506_v1 }
  0x24   :  { %444 = vmatpush3.bf16.msra.mxu0 %v478_v31 }
  0x25   :  { %445 = vmatprep.subr.bf16.mxu0 %v506_v1 }
  0x28   :  { %446 = vmatpush3.bf16.msra.mxu0 %v479_v32 }
  0xc8   :  { %v78_v23 = vpop.f32.mrf.mxu0 }
  0xc9   :  { %v79_v24 = vadd.f32 %v78_v23, %v32_v22 }
  0xca   :  { %v417_v25 = vpop.f32.mrf.mxu0 }
  0xcb   :  { %v84_v26 = vpack.c.bf16 %v79_v24, %v79_v24 }
  0xcc   :  { %v81_v27 = vpop.f32.mrf.mxu0 }
  0xcd   :  { %v85_v29 = vmax.bf16 %v509_v28, %v84_v26 }
  0xce   :  { %v418_v30 = vpop.f32.mrf.mxu0 }
  0xcf   :  { %428 = vmatmul.mubr.msk.bf16.vlgmr.msra.gmra.mxu1 %vm122_vm4, %v85_v29 }
  0xd0   :  { %459 = vmatprep.mubr.msk.bf16.mxu1 %vm508_vm2, %v506_v1  ;;  %452 = vmatpush3.bf16.msra.mxu1 %v480_v33 }
  0xd1   :  { %453 = vmatprep.subr.bf16.mxu1 %v506_v1 }
  0xd4   :  { %454 = vmatpush3.bf16.msra.mxu1 %v481_v34 }
  0xd5   :  { %455 = vmatprep.subr.bf16.mxu1 %v506_v1 }
  0xd8   :  { %456 = vmatpush3.bf16.msra.mxu1 %v482_v44 }
  0xd9   :  { %457 = vmatprep.subr.bf16.mxu1 %v506_v1 }
  0xdc   :  { %458 = vmatpush3.bf16.msra.mxu1 %v483_v45 }
 0x18f   :  { %v160_v37 = vpop.f32.mrf.mxu1 }
 0x190   :  { %v161_v38 = vadd.f32 %v160_v37, %v97_v36 }
 0x191   :  { %v429_v39 = vpop.f32.mrf.mxu1 }
 0x192   :  { %v166_v40 = vpack.c.bf16 %v161_v38, %v161_v38 }
 0x193   :  { %v163_v41 = vpop.f32.mrf.mxu1 }
 0x194   :  { %v167_v42 = vmax.bf16 %v509_v28, %v166_v40 }
 0x195   :  { %v430_v43 = vpop.f32.mrf.mxu1 }
 0x196   :  { %448 = vmatmul.mubr.bf16.vlgmr.msra.gmra.mxu0 %v167_v42 }
 0x256   :  { %v270_v48 = vpop.f32.mrf.mxu0 }
 0x257   :  { %v271_v49 = vadd.f32 %v270_v48, %v187_v47 }
 0x258   :  { %v449_v50 = vpop.f32.mrf.mxu0 }
 0x259   :  { %v276_v51 = vpack.c.bf16 %v271_v49, %v271_v49 }
 0x25a   :  { %v273_v52 = vpop.f32.mrf.mxu0 }
 0x25b   :  { %v277_v53 = vmax.bf16 %v509_v28, %v276_v51 }
 0x25c   :  { %v450_v54 = vpop.f32.mrf.mxu0 }
 0x25d   :  { %460 = vmatmul.mubr.msk.bf16.vlgmr.msra.gmra.mxu1 %vm122_vm4, %v277_v53 }
 0x31d   :  { %v351_v57 = vpop.f32.mrf.mxu1 }
 0x31e   :  { %v352_v58 = vadd.f32 %v351_v57, %v289_v56 }
 0x31f   :  { %v461_v59 = vpop.f32.mrf.mxu1 }
 0x320   :  { %358 = vst.msk [vmem:[#allocation2] sm:$0xff] %vm357_vm5, %v352_v58 }
 0x321   :  { %v354_v60 = vpop.f32.mrf.mxu1 }
 0x322   :  { %495 = shalt.err (!%p492_p4)
}
 0x323   :  { %368 = dma.vmem_to_hbm [thread:$0]  %s366_s29, 128, %s639_s6, [#allocation3]   ;;  %v462_v61 = vpop.f32.mrf.mxu1 }
 0x324   :  { %504 = dma.done.wait [#allocation3], 128  }
 0x325   :  { %505 = vsyncadd [#allocation3], 4294967168 }
 0x326   :  { %372 = vsyncpa [#allocation3], 1 }

</bundles_post_ra>
